<compile_context>
chip_gen: v7x
topology: tpu7x:2x2x1
jax: 0.10.0
libtpu: 0.0.40
codegen_flags: <defaults>
</compile_context>

<pallas_src>
import numpy as np
import jax
import jax.numpy as jnp
from jax.experimental import pallas as pl
from jax.experimental.pallas import tpu as pltpu


def _round_up(x, m):
    return ((x + m - 1) // m) * m


def _bond_vocab_kernel(emb_ref, halo_ref, w_ref, b_ref, o_ref):
    tm = o_ref.shape[0]            # output rows computed by this block
    halo = halo_ref[0]             # (1, in): emb[max(2*i*TM - 1, 0)] == emb[ids1[i*TM]]

    # ids2 rows: even rows of the slab (emb[2r]).
    x2 = emb_ref[pl.ds(0, tm, stride=2), :]
    # ids1 rows: halo row followed by the odd rows of the slab (emb[2r-1]).
    if tm > 1:
        x1 = jnp.concatenate([halo, emb_ref[pl.ds(1, tm - 1, stride=2), :]], axis=0)
    else:
        x1 = halo

    if w_ref.ndim == 2:
        # Fused path: W = [W1; W2] stacked along K -> single MXU pass, K = 2*in.
        x = jnp.concatenate([x1, x2], axis=-1)
        logits = jnp.dot(x, w_ref[...], preferred_element_type=jnp.float32)
    else:
        # in_features not lane-aligned: two dots, still f32 accumulation.
        logits = (jnp.dot(x1, w_ref[0], preferred_element_type=jnp.float32)
                  + jnp.dot(x2, w_ref[1], preferred_element_type=jnp.float32))
    logits = logits + b_ref[...].astype(jnp.float32)

    # Numerically stable log-softmax over the lane-dense (padded) vocab axis.
    # Padded lanes carry bias -1e30 so they never influence max / sum.
    m = jnp.max(logits, axis=-1, keepdims=True)
    shifted = logits - m
    lse = jnp.log(jnp.sum(jnp.exp(shifted), axis=-1, keepdims=True))
    o_ref[...] = (shifted - lse).astype(o_ref.dtype)


def _launch(emb_arr, halo_arr, w, b, *, tm, slab_rows, n_tiles, vp,
            parallel, vmem_limit_bytes):
    in_features = emb_arr.shape[1]
    rows_out = n_tiles * tm

    if w.ndim == 2:
        w_spec = pl.BlockSpec(w.shape, lambda i: (0, 0))
    else:
        w_spec = pl.BlockSpec(w.shape, lambda i: (0, 0, 0))

    cost = pl.CostEstimate(
        flops=int(2 * rows_out * 2 * in_features * vp),
        transcendentals=int(rows_out * vp),
        bytes_accessed=int(emb_arr.size * emb_arr.dtype.itemsize
                           + halo_arr.size * halo_arr.dtype.itemsize
                           + w.size * w.dtype.itemsize
                           + b.size * b.dtype.itemsize
                           + rows_out * vp * 4),
    )
    cp = dict(dimension_semantics=(("parallel",) if parallel else ("arbitrary",)))
    if vmem_limit_bytes is not None:
        cp["vmem_limit_bytes"] = int(vmem_limit_bytes)

    return pl.pallas_call(
        _bond_vocab_kernel,
        out_shape=jax.ShapeDtypeStruct((rows_out, vp), jnp.float32),
        grid_spec=pltpu.PrefetchScalarGridSpec(
            num_scalar_prefetch=0,
            grid=(n_tiles,),
            in_specs=[
                pl.BlockSpec((slab_rows, in_features), lambda i: (i, 0)),   # emb slab
                pl.BlockSpec((1, 1, in_features), lambda i: (i, 0, 0)),     # halo row
                w_spec,                                                     # resident W
                pl.BlockSpec((1, vp), lambda i: (0, 0)),                    # resident b
            ],
            out_specs=pl.BlockSpec((tm, vp), lambda i: (i, 0)),
        ),
        compiler_params=pltpu.CompilerParams(**cp),
        cost_estimate=cost,
    )(emb_arr, halo_arr, w, b)


def grover_bond_vocab_predictor(embeddings, w1, b1, w2, b2, *,
                                tile_rows=512, vmem_limit_bytes=None):
    """embeddings: (nm_bonds, in_features), nm_bonds odd (2*num_bonds + 1)
       w1, w2:     (in_features, vocab_size)   (PyTorch nn.Linear weight, transposed)
       b1, b2:     (vocab_size,) or (1, vocab_size)
       returns:    ((nm_bonds + 1)//2, vocab_size) float32 log-probabilities
    """
    embeddings = jnp.asarray(embeddings)
    w1 = jnp.asarray(w1)
    w2 = jnp.asarray(w2)
    nm_bonds, in_features = embeddings.shape
    if nm_bonds % 2 != 1:
        raise ValueError("GroverBondVocabPredictor expects 2*num_bonds + 1 embedding rows")
    vocab = w1.shape[1]
    n_out = (nm_bonds + 1) // 2
    vp = max(128, _round_up(vocab, 128))

    # ---- fold the two Linear layers into one padded parameter set (one-time, host)
    b = (jnp.asarray(b1).reshape(1, -1) + jnp.asarray(b2).reshape(1, -1)).astype(jnp.float32)
    pad = vp - vocab
    if pad:
        b = jnp.concatenate([b, jnp.full((1, pad), -1e30, jnp.float32)], axis=1)
        w1 = jnp.concatenate([w1, jnp.zeros((in_features, pad), w1.dtype)], axis=1)
        w2 = jnp.concatenate([w2, jnp.zeros((in_features, pad), w2.dtype)], axis=1)
    if in_features % 128 == 0:
        w = jnp.concatenate([w1, w2], axis=0)      # (2*in, vp): single-matmul path
    else:
        w = jnp.stack([w1, w2], axis=0)            # (2, in, vp): two-dot path

    # ---- tile size: keep double-buffered blocks comfortably inside scoped VMEM
    row_bytes = 4 * vp + 2 * in_features * embeddings.dtype.itemsize
    tm = min(int(tile_rows), max(8, (2 << 20) // row_bytes))
    tm = max(8, (tm // 8) * 8)

    n_full = nm_bonds // (2 * tm)     # tiles whose (2*tm)-row slab is fully in-bounds

    outs = []
    if n_full > 0:
        # per-tile halo row: emb[max(2*i*tm - 1, 0)]  (== emb[ids1[i*tm]]); tiny gather.
        halo_idx = jnp.maximum(2 * tm * jnp.arange(n_full, dtype=jnp.int32) - 1, 0)
        halo_main = embeddings[halo_idx][:, None, :]               # (n_full, 1, in)
        outs.append(_launch(embeddings, halo_main, w, b,
                            tm=tm, slab_rows=2 * tm, n_tiles=n_full, vp=vp,
                            parallel=True, vmem_limit_bytes=vmem_limit_bytes))

    # ---- ragged tail (< tm output rows): same kernel, exactly-sized blocks.
    tail_start = 2 * n_full * tm
    tail_rows = nm_bonds - tail_start                              # odd, >= 1, < 2*tm
    tm_tail = (tail_rows + 1) // 2
    emb_tail = jax.lax.slice_in_dim(embeddings, tail_start, nm_bonds, axis=0)
    h = max(tail_start - 1, 0)
    halo_tail = jax.lax.slice_in_dim(embeddings, h, h + 1, axis=0)[:, None, :]
    outs.append(_launch(emb_tail, halo_tail, w, b,
                        tm=tm_tail, slab_rows=tail_rows, n_tiles=1, vp=vp,
                        parallel=False, vmem_limit_bytes=None))

    out = outs[0] if len(outs) == 1 else jnp.concatenate(outs, axis=0)
    assert out.shape[0] == n_out, (out.shape, n_out)
    return out[:, :vocab]


def _reference(embeddings, w1, b1, w2, b2):
    nm_bonds = embeddings.shape[0]
    ids1 = np.array([0] + list(range(1, nm_bonds, 2)), dtype=np.int32)
    ids2 = np.array(list(range(0, nm_bonds, 2)), dtype=np.int32)
    logits = embeddings[ids1] @ w1 + b1 + embeddings[ids2] @ w2 + b2
    return jax.nn.log_softmax(logits, axis=1)


def _make_inputs(key, num_bonds, in_features, vocab_size):
    nm_bonds = num_bonds * 2 + 1                 # reverse bonds + padding row
    k_emb, k_w1, k_b1, k_w2, k_b2 = jax.random.split(key, 5)
    emb = jax.random.normal(k_emb, (nm_bonds, in_features), jnp.float32)
    bound = 1.0 / np.sqrt(in_features)           # nn.Linear-style init
    w1 = jax.random.uniform(k_w1, (in_features, vocab_size), jnp.float32, -bound, bound)
    b1 = jax.random.uniform(k_b1, (1, vocab_size), jnp.float32, -bound, bound)
    w2 = jax.random.uniform(k_w2, (in_features, vocab_size), jnp.float32, -bound, bound)
    b2 = jax.random.uniform(k_b2, (1, vocab_size), jnp.float32, -bound, bound)
    return emb, w1, b1, w2, b2


if __name__ == "__main__":
    key = jax.random.PRNGKey(0)
    k_a, k_b = jax.random.split(key)

    # Config A: module docstring shapes (num_bonds=20, in_features=16, vocab=10).
    # Exercises the non-lane-aligned (two-dot) weight path and the tail-only launch.
    emb, w1, b1, w2, b2 = _make_inputs(k_a, num_bonds=20, in_features=16, vocab_size=10)
    out_a = jax.block_until_ready(grover_bond_vocab_predictor(emb, w1, b1, w2, b2))
    ref_a = _reference(emb, w1, b1, w2, b2)
    assert out_a.shape == (21, 10), out_a.shape
    np.testing.assert_allclose(np.asarray(out_a), np.asarray(ref_a), atol=2e-4, rtol=2e-4)

    # Config B: lane-aligned in_features=128 (module default) with a small tile size
    # to exercise the tiled "parallel" grid, the fused single-matmul path, the
    # per-tile halo rows, and the 1-row tail launch.
    emb, w1, b1, w2, b2 = _make_inputs(k_b, num_bonds=32, in_features=128, vocab_size=32)
    out_b = jax.block_until_ready(
        grover_bond_vocab_predictor(emb, w1, b1, w2, b2, tile_rows=8))
    ref_b = _reference(emb, w1, b1, w2, b2)
    assert out_b.shape == (33, 32), out_b.shape
    np.testing.assert_allclose(np.asarray(out_b), np.asarray(ref_b), atol=2e-4, rtol=2e-4)

    print("KERNEL_OK")
</pallas_src>

<mosaic_0001>
module attributes {stable_mosaic.version = 11 : i64} {
  func.func @_bond_vocab_kernel(%arg0: i32, %arg1: memref<41x16xf32, #tpu.memory_space<vmem>>, %arg2: memref<1x1x16xf32, #tpu.memory_space<vmem>>, %arg3: memref<2x16x128xf32, #tpu.memory_space<vmem>>, %arg4: memref<1x128xf32, #tpu.memory_space<vmem>>, %arg5: memref<21x128xf32, #tpu.memory_space<vmem>>) attributes {dimension_semantics = [#tpu.dimension_semantics<arbitrary>], iteration_bounds = array<i64: 1>, scalar_prefetch = 0 : i64, scratch_operands = 0 : i64, tpu.core_type = #tpu.core_type<tc>, window_params = [{transform_indices = @transform_0, window_bounds = array<i64: 41, 16>}, {transform_indices = @transform_1, window_bounds = array<i64: 1, 1, 16>}, {pipeline_mode = #tpu.pipeline_mode<synchronous>, transform_indices = @transform_2, window_bounds = array<i64: 2, 16, 128>}, {pipeline_mode = #tpu.pipeline_mode<synchronous>, transform_indices = @transform_3, window_bounds = array<i64: 1, 128>}, {transform_indices = @transform_4, window_bounds = array<i64: 21, 128>}]} {
    %c0 = arith.constant 0 : index
    %c0_0 = arith.constant 0 : index
    %c0_1 = arith.constant 0 : index
    %0 = vector.load %arg2[%c0, %c0_0, %c0_1] : memref<1x1x16xf32, #tpu.memory_space<vmem>>, vector<1x1x16xf32>
    %1 = vector.shape_cast %0 : vector<1x1x16xf32> to vector<1x16xf32>
    %c0_2 = arith.constant 0 : index
    %c0_3 = arith.constant 0 : index
    %2 = tpu.strided_load %arg1[%c0_2, %c0_3] {strides = array<i32: 2, 1>} : memref<41x16xf32, #tpu.memory_space<vmem>>, vector<21x16xf32>
    %c1 = arith.constant 1 : index
    %c0_4 = arith.constant 0 : index
    %3 = tpu.strided_load %arg1[%c1, %c0_4] {strides = array<i32: 2, 1>} : memref<41x16xf32, #tpu.memory_space<vmem>>, vector<20x16xf32>
    %4 = tpu.concatenate %1, %3 in 0 : vector<1x16xf32>, vector<20x16xf32> -> vector<21x16xf32>
    %c0_5 = arith.constant 0 : index
    %c0_6 = arith.constant 0 : index
    %c0_7 = arith.constant 0 : index
    %5 = vector.load %arg3[%c0_5, %c0_6, %c0_7] : memref<2x16x128xf32, #tpu.memory_space<vmem>>, vector<1x16x128xf32>
    %6 = vector.shape_cast %5 : vector<1x16x128xf32> to vector<16x128xf32>
    %cst = arith.constant dense<0.000000e+00> : vector<21x128xf32>
    %7 = tpu.matmul %4, %6, %cst {dimension_numbers = #tpu.dot_dimension_numbers<[1], [0], [0], [1], [0, 0, 1, 1], [], []>} : vector<21x16xf32>, vector<16x128xf32>, vector<21x128xf32> -> vector<21x128xf32>
    %c1_8 = arith.constant 1 : index
    %c0_9 = arith.constant 0 : index
    %c0_10 = arith.constant 0 : index
    %8 = vector.load %arg3[%c1_8, %c0_9, %c0_10] : memref<2x16x128xf32, #tpu.memory_space<vmem>>, vector<1x16x128xf32>
    %9 = vector.shape_cast %8 : vector<1x16x128xf32> to vector<16x128xf32>
    %cst_11 = arith.constant dense<0.000000e+00> : vector<21x128xf32>
    %10 = tpu.matmul %2, %9, %cst_11 {dimension_numbers = #tpu.dot_dimension_numbers<[1], [0], [0], [1], [0, 0, 1, 1], [], []>} : vector<21x16xf32>, vector<16x128xf32>, vector<21x128xf32> -> vector<21x128xf32>
    %11 = arith.addf %7, %10 : vector<21x128xf32>
    %c0_12 = arith.constant 0 : index
    %c0_13 = arith.constant 0 : index
    %12 = vector.load %arg4[%c0_12, %c0_13] : memref<1x128xf32, #tpu.memory_space<vmem>>, vector<1x128xf32>
    %13 = vector.broadcast %12 : vector<1x128xf32> to vector<21x128xf32>
    %14 = arith.addf %11, %13 : vector<21x128xf32>
    %cst_14 = arith.constant dense<0xFF800000> : vector<21xf32>
    %15 = vector.multi_reduction <maximumf>, %14, %cst_14 [1] : vector<21x128xf32> to vector<21xf32>
    %16 = vector.shape_cast %15 : vector<21xf32> to vector<21x1xf32>
    %17 = vector.broadcast %16 : vector<21x1xf32> to vector<21x128xf32>
    %18 = arith.subf %14, %17 : vector<21x128xf32>
    %19 = math.exp %18 : vector<21x128xf32>
    %cst_15 = arith.constant dense<0.000000e+00> : vector<21xf32>
    %20 = vector.multi_reduction <add>, %19, %cst_15 [1] : vector<21x128xf32> to vector<21xf32>
    %21 = vector.shape_cast %20 : vector<21xf32> to vector<21x1xf32>
    %22 = math.log %21 : vector<21x1xf32>
    %23 = vector.broadcast %22 : vector<21x1xf32> to vector<21x128xf32>
    %24 = arith.subf %18, %23 : vector<21x128xf32>
    %c0_16 = arith.constant 0 : index
    %c0_17 = arith.constant 0 : index
    %25 = vector.load %arg5[%c0_16, %c0_17] : memref<21x128xf32, #tpu.memory_space<vmem>>, vector<21x128xf32>
    tpu.vector_store %arg5[%c0_16, %c0_17], %24 {strides = array<i32>} : memref<21x128xf32, #tpu.memory_space<vmem>>, vector<21x128xf32>,
    return
  }
  func.func @transform_0(%arg0: i32) -> (i32, i32) {
    %c0_i32 = arith.constant 0 : i32
    %c0_i32_0 = arith.constant 0 : i32
    return %arg0, %c0_i32 : i32, i32
  }
  func.func @transform_1(%arg0: i32) -> (i32, i32, i32) {
    %c0_i32 = arith.constant 0 : i32
    %c0_i32_0 = arith.constant 0 : i32
    %c0_i32_1 = arith.constant 0 : i32
    return %arg0, %c0_i32, %c0_i32_0 : i32, i32, i32
  }
  func.func @transform_2(%arg0: i32) -> (i32, i32, i32) {
    %c0_i32 = arith.constant 0 : i32
    %c0_i32_0 = arith.constant 0 : i32
    %c0_i32_1 = arith.constant 0 : i32
    %c0_i32_2 = arith.constant 0 : i32
    return %c0_i32, %c0_i32_0, %c0_i32_1 : i32, i32, i32
  }
  func.func @transform_3(%arg0: i32) -> (i32, i32) {
    %c0_i32 = arith.constant 0 : i32
    %c0_i32_0 = arith.constant 0 : i32
    %c0_i32_1 = arith.constant 0 : i32
    return %c0_i32, %c0_i32_0 : i32, i32
  }
  func.func @transform_4(%arg0: i32) -> (i32, i32) {
    %c0_i32 = arith.constant 0 : i32
    %c0_i32_0 = arith.constant 0 : i32
    return %arg0, %c0_i32 : i32, i32
  }
}

</mosaic_0001>

<bundles_post_ra>
// kernel: tpu_custom_call.1
= control target key start
LH: loop header
LB: loop body
LE: loop exit
PB: predicated region body
PF: predicated region fallthrough
CT: control target
= control target key end

     0   :  { %v383_v3 = vmov 0.0|0.0   ;;  %vm384_vm0 = vmmov 0   ;;  %v385_v7 = vmov 0.0   ;;  %vm33_vm1 = vcmask 1040384   ;;  %s479_s0 = inlined_call_operand.vmem [shape: f32[41,16], index: 0, kind: input, shape index: {}]   ;;  %s480_s1 = inlined_call_operand.vmem [shape: f32[1,1,16], index: 1, kind: input, shape index: {}]   ;;  %s481_s2 = inlined_call_operand.vmem [shape: f32[2,16,128], index: 2, kind: input, shape index: {}]   ;;  %s482_s3 = inlined_call_operand.vmem [shape: f32[1,128], index: 3, kind: input, shape index: {}]   ;;  %s483_s4 = inlined_call_operand.hbm [shape: f32[21,128], index: 4, kind: output, shape index: {}]  }
   0x1   :  { %v290_v0 = vld [vmem:[%s481_s2 + $0x10] sm:$0xff]  ;;  %v291_v1 = vld [vmem:[%s481_s2 + $0x18] sm:$0xff]  ;;  %v41_v2 = vld [vmem:[%s481_s2] sm:$0xff]  ;;  %335 = vmatprep.subr.bf16.mxu0 %v383_v3  ;;  %338 = vmatprep.subr.bf16.mxu1 %v383_v3  ;;  %vm46_vm2 = vcmask 130048  }
   0x2   :  { %v336_v4 = vpack.c.bf16 %v291_v1, %v290_v0  ;;  %v42_v5 = vld [vmem:[%s481_s2 + $0x8] sm:$0xff]  ;;  %313 = vmatprep.mubr.msk.f32.mxu0 %vm384_vm0, %v385_v7  ;;  %326 = vmatprep.mubr.msk.f32.mxu1 %vm384_vm0, %v385_v7  ;;  %v18_v8 = vld [vmem:[%s480_s1] sm:$0x1]  ;;  %v288_v12 = vld [vmem:[%s479_s0 + $0x11] ss:$2 sm:$0xff] }
   0x3   :  { %v339_v6 = vpack.c.bf16 %v42_v5, %v41_v2  ;;  %v287_v9 = vld [vmem:[%s479_s0 + $0x1] ss:$2 sm:$0xff]  ;;  %v19_v10 = vld [vmem:[%s479_s0] ss:$2 sm:$0xff]  ;;  %v35_v13 = vrot.slane %v288_v12, 7 }
   0x4   :  { %337 = vmatpush3.bf16.msra.mxu0 %v336_v4  ;;  %v34_v11 = vrot.slane %v287_v9, 7 }
   0x5   :  { %340 = vmatpush3.bf16.msra.mxu1 %v339_v6 }
   0x6   :  { %9 = vsyncpa [#allocation3], 0  ;;  %v40_v14 = vsel %vm33_vm1, %v18_v8, %v34_v11  ;;  %v289_v15 = vld [vmem:[%s479_s0 + $0x21] ss:$2 sm:$0xf]  ;;  %v36_v17 = vsel %vm33_vm1, %v34_v11, %v35_v13  ;;  %vm237_vm3 = vcmask 1044480  }
   0x7   :  { %314 = vmatmul.mubr.msk.f32.vlgmr.msra.gmra.mrb[0].mxu0 %vm46_vm2, %v19_v10  ;;  %v285_v16 = vld [vmem:[%s479_s0 + $0x10] ss:$2 sm:$0xff]  ;;  %v37_v18 = vrot.slane %v289_v15, 7  ;;  %v286_v19 = vld [vmem:[%s479_s0 + $0x20] ss:$2 sm:$0x1f] }
   0x8   :  { %327 = vmatmul.mubr.msk.f32.vlgmr.msra.gmra.mrb[0].mxu1 %vm46_vm2, %v40_v14  ;;  %316 = vmatprep.mubr.msk.f32.mxu0 %vm384_vm0, %v385_v7  ;;  %v298_v31 = vld [vmem:[%s482_s3] ss:$0 sm:$0xff]  ;;  %s386_s3 = smov [#allocation2]  }
   0x9   :  { %329 = vmatprep.mubr.msk.f32.mxu1 %vm384_vm0, %v385_v7  ;;  %v38_v20 = vsel %vm33_vm1, %v35_v13, %v37_v18  ;;  %s274_s10 = sshll.u32 %s386_s3, 4  ;;  %s275_s10 = int_to_ptr.vmem [resolvable:$true] %s274_s10 }
   0xa   :  { %s359_s11 = scalar_lea.vmem %s275_s10, 384  ;;  %p364_p1 = scmp.lt.s32.totalorder %s275_s10, %s275_s10 }
   0xb   :  { %317 = vmatmul.mubr.msk.f32.gmra.mrb[2].mxu0 %vm46_vm2, %v285_v16  ;;  %p360_p0 = scmp.ne.s32.totalorder %s275_s10, %s359_s11  ;;  %p365_p2 = scmp.lt.s32.totalorder %s359_s11, %s359_s11 }
   0xc   :  { %330 = vmatmul.mubr.msk.f32.gmra.mrb[2].mxu1 %vm46_vm2, %v36_v17  ;;  %319 = vmatprep.mubr.msk.f32.mxu0 %vm384_vm0, %v385_v7 }
   0xd   :  { %332 = vmatprep.mubr.msk.f32.mxu1 %vm384_vm0, %v385_v7  ;;  %p366_p3 = por %p365_p2, %p364_p1 }
   0xf   :  { %320 = vmatmul.mubr.msk.f32.gmra.mrb[4].mxu0 %vm46_vm2, %v286_v19  ;;  %p367_p4 = pnand %p366_p3, %p360_p0 }
  0x10   :  { %333 = vmatmul.mubr.msk.f32.gmra.mrb[4].mxu1 %vm46_vm2, %v38_v20 }
  0xda   :  { %v122_v21 = vpop.f32.mrb[0].mxu0 }
  0xdb   :  { %v209_v22 = vpop.f32.mrb[0].mxu1  ;;  %v315_v23 = vpop.f32.mrb[1].mxu0 }
  0xdc   :  { %v210_v24 = vadd.f32 %v209_v22, %v122_v21  ;;  %v328_v25 = vpop.f32.mrb[1].mxu1 }
  0xde   :  { %v127_v26 = vpop.f32.mrb[2].mxu0  ;;  %v230_v40 = vadd.f32 %v298_v31, %v210_v24 }
  0xdf   :  { %v214_v27 = vpop.f32.mrb[2].mxu1  ;;  %v318_v28 = vpop.f32.mrb[3].mxu0 }
  0xe0   :  { %v215_v29 = vadd.f32 %v214_v27, %v127_v26  ;;  %v331_v30 = vpop.f32.mrb[3].mxu1 }
  0xe2   :  { %v132_v32 = vpop.f32.mrb[4].mxu0  ;;  %v231_v33 = vadd.f32 %v298_v31, %v215_v29 }
  0xe3   :  { %v219_v34 = vpop.f32.mrb[4].mxu1  ;;  %v321_v35 = vpop.f32.mrb[5].mxu0 }
  0xe4   :  { %v220_v36 = vadd.f32 %v219_v34, %v132_v32  ;;  %235 = vmax.xlane.f32.xlu1 %v231_v33  ;;  %v334_v37 = vpop.f32.mrb[5].mxu1 }
  0xe6   :  { %v232_v38 = vadd.f32 %v298_v31, %v220_v36 }
  0xe8   :  { %v238_v39 = vsel %vm237_vm3, %v232_v38, -inf }
  0xe9   :  { %239 = vmax.xlane.f32.xlu0 %v238_v39 }
  0xed   :  { %233 = vmax.xlane.f32.xlu0 %v230_v40 }
 0x171   :  { %v236_v41 = vpop.xlane.xlu1 %235 }
 0x172   :  { %v242_v42 = vsub.f32 %v231_v33, %v236_v41 }
 0x174   :  { %v246_v43 = vmul.f32 1.442695, %v242_v42 }
 0x176   :  { %347 = vpow2.f32 %v246_v43  ;;  %v240_v44 = vpop.xlane.xlu0 %239 }
 0x177   :  { %v243_v45 = vsub.f32 %v232_v38, %v240_v44 }
 0x179   :  { %v248_v48 = vmul.f32 1.442695, %v243_v45 }
 0x17a   :  { %v234_v46 = vpop.xlane.xlu0 %233 }
 0x17b   :  { %v241_v47 = vsub.f32 %v230_v40, %v234_v46 }
 0x17d   :  { %v244_v49 = vmul.f32 1.442695, %v241_v47 }
 0x17f   :  { %349 = vpow2.f32 %v244_v49 }
 0x180   :  { %v348_v50 = vpop.eup %347  ;;  %351 = vpow2.f32 %v248_v48 }
 0x181   :  { %252 = vadd.xlane.f32.xlu0 %v348_v50 }
 0x189   :  { %v350_v51 = vpop.eup %349 }
 0x18a   :  { %v352_v52 = vpop.eup %351  ;;  %250 = vadd.xlane.f32.xlu1 %v350_v51 }
 0x18b   :  { %v254_v53 = vsel %vm237_vm3, %v352_v52, 0.0 }
 0x18e   :  { %255 = vadd.xlane.f32.xlu1 %v254_v53 }
 0x20e   :  { %v253_v54 = vpop.xlane.xlu0 %252 }
 0x20f   :  { %353 = vlog2.f32 %v253_v54 }
 0x217   :  { %v251_v55 = vpop.xlane.xlu1 %250 }
 0x218   :  { %355 = vlog2.f32 %v251_v55 }
 0x219   :  { %v354_v56 = vpop.eup %353 }
 0x21a   :  { %v260_v57 = vmul.f32 0.6931472, %v354_v56 }
 0x21b   :  { %v256_v58 = vpop.xlane.xlu1 %255 }
 0x21c   :  { %v264_v59 = vsub.f32 %v242_v42, %v260_v57  ;;  %357 = vlog2.f32 %v256_v58 }
 0x21e   :  { %267 = vst [vmem:[#allocation2 + $0x8] sm:$0xff] %v264_v59 }
 0x222   :  { %v356_v60 = vpop.eup %355 }
 0x223   :  { %v258_v61 = vmul.f32 0.6931472, %v356_v60 }
 0x225   :  { %v263_v62 = vsub.f32 %v241_v47, %v258_v61 }
 0x226   :  { %v358_v63 = vpop.eup %357 }
 0x227   :  { %266 = vst [vmem:[#allocation2] sm:$0xff] %v263_v62  ;;  %v262_v0 = vmul.f32 0.6931472, %v358_v63 }
 0x229   :  { %v265_v1 = vsub.f32 %v243_v45, %v262_v0 }
 0x22b   :  { %268 = vst [vmem:[#allocation2 + $0x10] sm:$0x1f] %v265_v1 }
 0x22c   :  { %370 = shalt.err (!%p367_p4)
}
 0x22d   :  { %s371_s14 = scalar_lea.hbm %s483_s4, 384 }
 0x22e   :  { %p372_p5 = scmp.ne.s32.totalorder %s483_s4, %s371_s14  ;;  %p375_p6 = scmp.lt.u32.totalorder %s371_s14, %s483_s4 }
 0x230   :  { %p377_p7 = pnand %p375_p6, %p372_p5 }
 0x232   :  { %380 = shalt.err (!%p377_p7)
}
 0x233   :  { %s387_s19 = smov 128   ;;  %s388_s20 = smov 8  }
 0x234   :  { %280 = dma.vmem_to_hbm [thread:$0]  %s275_s10, 384, %s483_s4, [#allocation3], %s387_s19, %s387_s19, %s388_s20  }
 0x235   :  { %381 = dma.done.wait [#allocation3], 384  }
 0x236   :  { %382 = vsyncadd [#allocation3], 4294966912 }
 0x237   :  { %284 = vsyncpa [#allocation3], 1 }

</bundles_post_ra>
